<compile_context>
chip_gen: v5e
topology: v5e:2x2
jax: 0.10.0
libtpu: 0.0.40
codegen_flags: <defaults>
</compile_context>

<pallas_src>
import jax
import jax.numpy as jnp
from jax.experimental import pallas as pl
from jax.experimental.pallas import tpu as pltpu

EPS = 1e-8

# Block budget per (Bt, S, TF) slab (input itemsize). With double-buffered input
# and output this gives ~4x this footprint in pipeline buffers, comfortably under
# the VMEM limit below on every generation (v5e/v6e 128 MiB, v7x 64 MiB physical).
_TARGET_BLOCK_BYTES = 4 * 1024 * 1024
# Safe on all generations: below v7x's 64 MiB physical VMEM, well above the
# default scoped limits (16 MiB v5e / 32 MiB v6e, v7x).
_VMEM_LIMIT_BYTES = 48 * 1024 * 1024


def _standardize_kernel(x_ref, o_ref):
    # x_ref block: (Bt, S, TF). Reduction is over axis 1 (S), entirely in-block.
    x = x_ref[...].astype(jnp.float32)
    s = x.shape[1]
    inv_n = jnp.float32(1.0 / s)
    # Unbiased variance (ddof=1) to match torch.std default. S == 1 reproduces
    # torch's NaN/inf behavior via an inf multiplier instead of tripping a
    # trace-time ZeroDivisionError.
    inv_nm1 = jnp.float32(1.0 / (s - 1)) if s > 1 else jnp.float32(float("inf"))

    mean = jnp.sum(x, axis=1, keepdims=True) * inv_n            # (Bt, 1, TF)
    diff = x - mean                                             # (Bt, S, TF)
    var = jnp.sum(diff * diff, axis=1, keepdims=True) * inv_nm1 # (Bt, 1, TF)
    std = jnp.sqrt(var) + jnp.float32(EPS)
    # Exact reciprocal on the small (Bt, 1, TF) row: far cheaper than S*TF
    # divides and keeps the 1e-5 tolerance vs. the reference intact.
    inv_std = pl.reciprocal(std, approx=False)
    # Re-read x from VMEM for the store path instead of keeping `diff` live
    # across the reduction (vld slot has plenty of slack in a mem-bound kernel).
    o_ref[...] = ((x_ref[...].astype(jnp.float32) - mean) * inv_std).astype(o_ref.dtype)


def _choose_tiles(B, S, F, itemsize, target_block_bytes):
    """Pick (Bt, TF): feature tile TF (multiple of 128 dividing F when possible)
    and batch-pack factor Bt (divisor of B), keeping Bt*S*TF*itemsize near target."""
    if F % 128 == 0:
        divisors = [d for d in range(128, F + 1, 128) if F % d == 0]
        fitting = [d for d in divisors if S * d * itemsize <= target_block_bytes]
        tf = max(fitting) if fitting else min(divisors)
    else:
        # Block dim must equal the full F when it can't be lane-tiled by 128.
        tf = F
    bt = 1
    for d in range(B, 0, -1):
        if B % d == 0 and d * S * tf * itemsize <= target_block_bytes:
            bt = d
            break
    return bt, tf


def feature_wise_standardization(x):
    """x: (B, S, F). Returns (x - mean_S) / (std_S + eps), per sample & feature."""
    B, S, F = x.shape
    itemsize = jnp.dtype(x.dtype).itemsize
    bt, tf = _choose_tiles(B, S, F, itemsize, _TARGET_BLOCK_BYTES)

    grid = (B // bt, F // tf)
    block = (bt, S, tf)

    cost = pl.CostEstimate(
        flops=5 * B * S * F,                 # sum, diff, square, sum, mul (approx)
        transcendentals=2 * B * F,           # sqrt + reciprocal per feature row
        bytes_accessed=2 * B * S * F * itemsize,
    )

    return pl.pallas_call(
        _standardize_kernel,
        out_shape=jax.ShapeDtypeStruct((B, S, F), x.dtype),
        grid_spec=pltpu.PrefetchScalarGridSpec(
            num_scalar_prefetch=0,
            grid=grid,
            in_specs=[pl.BlockSpec(block, lambda b, f: (b, 0, f))],
            out_specs=pl.BlockSpec(block, lambda b, f: (b, 0, f)),
        ),
        compiler_params=pltpu.CompilerParams(
            dimension_semantics=("parallel", "parallel"),
            vmem_limit_bytes=_VMEM_LIMIT_BYTES,
        ),
        cost_estimate=cost,
    )(x)


if __name__ == "__main__":
    key = jax.random.PRNGKey(0)
    B, S, F = 2, 8, 32                      # batch, seq (dim=1 reduction), features
    x = jax.random.normal(key, (B, S, F), dtype=jnp.float32) * 3.0 + 1.5

    out = feature_wise_standardization(x)
    out = jax.block_until_ready(out)

    # pure-JAX reference (unbiased std, matching torch.std default)
    mean = jnp.mean(x, axis=1, keepdims=True)
    std = jnp.std(x, axis=1, keepdims=True, ddof=1) + EPS
    ref = (x - mean) / std
    assert out.shape == ref.shape
    assert jnp.allclose(out, ref, atol=1e-5, rtol=1e-5), "mismatch vs reference"

    print("KERNEL_OK")
</pallas_src>

<mosaic_0001>
module attributes {stable_mosaic.version = 11 : i64} {
  func.func @_standardize_kernel(%arg0: i32, %arg1: i32, %arg2: memref<2x8x32xf32, #tpu.memory_space<vmem>>, %arg3: memref<2x8x32xf32, #tpu.memory_space<vmem>>) attributes {dimension_semantics = [#tpu.dimension_semantics<parallel>, #tpu.dimension_semantics<parallel>], iteration_bounds = array<i64: 1, 1>, scalar_prefetch = 0 : i64, scratch_operands = 0 : i64, tpu.core_type = #tpu.core_type<tc>, window_params = [{transform_indices = @transform_0, window_bounds = array<i64: 2, 8, 32>}, {transform_indices = @transform_1, window_bounds = array<i64: 2, 8, 32>}]} {
    %c0 = arith.constant 0 : index
    %c0_0 = arith.constant 0 : index
    %c0_1 = arith.constant 0 : index
    %0 = vector.load %arg2[%c0, %c0_0, %c0_1] : memref<2x8x32xf32, #tpu.memory_space<vmem>>, vector<2x8x32xf32>
    %cst = arith.constant dense<0.000000e+00> : vector<2x32xf32>
    %1 = vector.multi_reduction <add>, %0, %cst [1] : vector<2x8x32xf32> to vector<2x32xf32>
    %2 = vector.shape_cast %1 : vector<2x32xf32> to vector<2x1x32xf32>
    %cst_2 = arith.constant 1.250000e-01 : f32
    %3 = vector.broadcast %cst_2 : f32 to vector<2x1x32xf32>
    %4 = arith.mulf %2, %3 : vector<2x1x32xf32>
    %5 = vector.broadcast %4 : vector<2x1x32xf32> to vector<2x8x32xf32>
    %6 = arith.subf %0, %5 : vector<2x8x32xf32>
    %7 = arith.mulf %6, %6 : vector<2x8x32xf32>
    %cst_3 = arith.constant dense<0.000000e+00> : vector<2x32xf32>
    %8 = vector.multi_reduction <add>, %7, %cst_3 [1] : vector<2x8x32xf32> to vector<2x32xf32>
    %9 = vector.shape_cast %8 : vector<2x32xf32> to vector<2x1x32xf32>
    %cst_4 = arith.constant 0.142857149 : f32
    %10 = vector.broadcast %cst_4 : f32 to vector<2x1x32xf32>
    %11 = arith.mulf %9, %10 : vector<2x1x32xf32>
    %12 = math.sqrt %11 : vector<2x1x32xf32>
    %cst_5 = arith.constant 9.99999993E-9 : f32
    %13 = vector.broadcast %cst_5 : f32 to vector<2x1x32xf32>
    %14 = arith.addf %12, %13 : vector<2x1x32xf32>
    %15 = tpu.reciprocal %14 : vector<2x1x32xf32> -> vector<2x1x32xf32>
    %c0_6 = arith.constant 0 : index
    %c0_7 = arith.constant 0 : index
    %c0_8 = arith.constant 0 : index
    %16 = vector.load %arg2[%c0_6, %c0_7, %c0_8] : memref<2x8x32xf32, #tpu.memory_space<vmem>>, vector<2x8x32xf32>
    %17 = vector.broadcast %4 : vector<2x1x32xf32> to vector<2x8x32xf32>
    %18 = arith.subf %16, %17 : vector<2x8x32xf32>
    %19 = vector.broadcast %15 : vector<2x1x32xf32> to vector<2x8x32xf32>
    %20 = arith.mulf %18, %19 : vector<2x8x32xf32>
    %c0_9 = arith.constant 0 : index
    %c0_10 = arith.constant 0 : index
    %c0_11 = arith.constant 0 : index
    %21 = vector.load %arg3[%c0_9, %c0_10, %c0_11] : memref<2x8x32xf32, #tpu.memory_space<vmem>>, vector<2x8x32xf32>
    tpu.vector_store %arg3[%c0_9, %c0_10, %c0_11], %20 {strides = array<i32>} : memref<2x8x32xf32, #tpu.memory_space<vmem>>, vector<2x8x32xf32>,
    return
  }
  func.func @transform_0(%arg0: i32, %arg1: i32) -> (i32, i32, i32) {
    %c0_i32 = arith.constant 0 : i32
    %c0_i32_0 = arith.constant 0 : i32
    return %arg0, %c0_i32, %arg1 : i32, i32, i32
  }
  func.func @transform_1(%arg0: i32, %arg1: i32) -> (i32, i32, i32) {
    %c0_i32 = arith.constant 0 : i32
    %c0_i32_0 = arith.constant 0 : i32
    return %arg0, %c0_i32, %arg1 : i32, i32, i32
  }
}

</mosaic_0001>

<bundles_post_ra>
// kernel: tpu_custom_call.1
= control target key start
LH: loop header
LB: loop body
LE: loop exit
PB: predicated region body
PF: predicated region fallthrough
CT: control target
= control target key end

     0   :  { %6 = vsyncpa [#allocation3], 0  ;;  %s247_s0 = inlined_call_operand.hbm [shape: f32[2,8,32], index: 0, kind: input, shape index: {}]   ;;  %s248_s1 = inlined_call_operand.hbm [shape: f32[2,8,32], index: 1, kind: output, shape index: {}]  }
   0x1   :  { %7 = vsyncpa [#allocation4], 0  ;;  %s12_s8 = sshll.u32 %s247_s0, 4  ;;  %s205_s9 = smov [#allocation2]   ;;  %s13_s8 = int_to_ptr.hbm [resolvable:$true] %s12_s8 }
   0x2   :  { %s14_s10 = sshll.u32 %s205_s9, 4  ;;  %s206_s11 = smov 128   ;;  %s15_s10 = int_to_ptr.vmem [resolvable:$true] %s14_s10 }
   0x3   :  { %s207_s12 = smov 8  }
   0x4   :  { %20 = dma.hbm_to_vmem [thread:$0]  %s13_s8, 256, %s15_s10, [#allocation3], %s206_s11, %s206_s11, %s207_s12  }
   0x5   :  { %201 = dma.done.wait [#allocation3], 256  }
   0x6   :  { %202 = vsyncadd [#allocation3], 4294967040  ;;  %vm27_vm0 = vcmask 261120   ;;  %v25_v0 = vld [vmem:[#allocation2] sm:$0xff]  ;;  %v26_v1 = vld [vmem:[#allocation2 + $0x8] sm:$0xff]  ;;  %s208_s0 = smov [#allocation5]  }
   0x7   :  { %v28_v2 = vsel %vm27_vm0, %v25_v0, 0.0  ;;  %v35_v3 = vsel %vm27_vm0, %v26_v1, 0.0  ;;  %s126_s13 = sshll.u32 %s208_s0, 4  ;;  %s128_s16 = sshll.u32 %s248_s1, 4  ;;  %s127_s13 = int_to_ptr.vmem [resolvable:$true] %s126_s13  ;;  %s129_s16 = int_to_ptr.hbm [resolvable:$true] %s128_s16 }
   0x8   :  { %v29_v4 = vrot.slane %v28_v2, 4  ;;  %v36_v5 = vrot.slane %v35_v3, 4 }
   0xa   :  { %v30_v6 = vadd.f32 %v29_v4, %v28_v2  ;;  %v37_v7 = vadd.f32 %v36_v5, %v35_v3 }
   0xc   :  { %v31_v8 = vrot.slane %v30_v6, 2  ;;  %v38_v9 = vrot.slane %v37_v7, 2 }
   0xe   :  { %v32_v10 = vadd.f32 %v31_v8, %v30_v6  ;;  %v39_v11 = vadd.f32 %v38_v9, %v37_v7 }
  0x10   :  { %v33_v12 = vrot.slane %v32_v10, 1  ;;  %v40_v13 = vrot.slane %v39_v11, 1 }
  0x12   :  { %v34_v14 = vadd.f32 %v33_v12, %v32_v10  ;;  %v41_v15 = vadd.f32 %v40_v13, %v39_v11 }
  0x14   :  { %v42_v16 = vmul.f32 0.125, %v34_v14  ;;  %v43_v17 = vmul.f32 0.125, %v41_v15 }
  0x16   :  { %v227_v18 = vsub.f32 %v25_v0, %v42_v16  ;;  %v229_v19 = vsub.f32 %v26_v1, %v43_v17 }
  0x18   :  { %v46_v20 = vmul.f32 %v227_v18, %v227_v18  ;;  %v47_v21 = vmul.f32 %v229_v19, %v229_v19 }
  0x1a   :  { %v48_v22 = vsel %vm27_vm0, %v46_v20, 0.0  ;;  %v55_v23 = vsel %vm27_vm0, %v47_v21, 0.0 }
  0x1b   :  { %v49_v24 = vrot.slane %v48_v22, 4  ;;  %v56_v25 = vrot.slane %v55_v23, 4 }
  0x1d   :  { %v50_v26 = vadd.f32 %v49_v24, %v48_v22  ;;  %v57_v27 = vadd.f32 %v56_v25, %v55_v23 }
  0x1f   :  { %v51_v28 = vrot.slane %v50_v26, 2  ;;  %v58_v29 = vrot.slane %v57_v27, 2 }
  0x21   :  { %v52_v30 = vadd.f32 %v51_v28, %v50_v26  ;;  %v59_v31 = vadd.f32 %v58_v29, %v57_v27 }
  0x23   :  { %v53_v32 = vrot.slane %v52_v30, 1  ;;  %v60_v33 = vrot.slane %v59_v31, 1 }
  0x25   :  { %v54_v34 = vadd.f32 %v53_v32, %v52_v30  ;;  %v61_v35 = vadd.f32 %v60_v33, %v59_v31 }
  0x27   :  { %v62_v36 = vmul.f32 0.14285715, %v54_v34  ;;  %v63_v37 = vmul.f32 0.14285715, %v61_v35 }
  0x29   :  { %145 = vrsqrt.f32 %v62_v36  ;;  %vm71_vm1 = vcmp.eq.f32.partialorder %v62_v36, inf  ;;  %v74_v49 = vand.u32 2147483648, %v62_v36  ;;  %vm73_vm2 = vcmp.eq.f32.partialorder %v62_v36, 0.0 }
  0x2a   :  { %147 = vrsqrt.f32 %v63_v37  ;;  %vm83_vm3 = vcmp.eq.f32.partialorder %v63_v37, inf  ;;  %v86_v52 = vand.u32 2147483648, %v63_v37  ;;  %vm85_vm4 = vcmp.eq.f32.partialorder %v63_v37, 0.0 }
  0x2f   :  { %v146_v38 = vpop.eup %145 }
  0x30   :  { %v148_v39 = vpop.eup %147  ;;  %v65_v40 = vmul.f32 %v146_v38, %v62_v36 }
  0x31   :  { %v77_v41 = vmul.f32 %v148_v39, %v63_v37 }
  0x32   :  { %v66_v42 = vmul.f32 %v146_v38, %v65_v40 }
  0x33   :  { %v78_v43 = vmul.f32 %v148_v39, %v77_v41 }
  0x34   :  { %v67_v44 = vmul.f32 0.5, %v66_v42 }
  0x35   :  { %v79_v45 = vmul.f32 0.5, %v78_v43 }
  0x36   :  { %v68_v46 = vsub.f32 1.5, %v67_v44 }
  0x37   :  { %v80_v47 = vsub.f32 1.5, %v79_v45 }
  0x38   :  { %v69_v48 = vmul.f32 %v146_v38, %v68_v46 }
  0x39   :  { %v81_v50 = vmul.f32 %v148_v39, %v80_v47 }
  0x3a   :  { %v70_v51 = vmul.f32 %v69_v48, %v62_v36 }
  0x3b   :  { %v82_v53 = vmul.f32 %v81_v50, %v63_v37 }
  0x3c   :  { %v72_v54 = vsel %vm71_vm1, %v62_v36, %v70_v51 }
  0x3d   :  { %v75_v55 = vsel %vm73_vm2, %v74_v49, %v72_v54  ;;  %v84_v56 = vsel %vm83_vm3, %v63_v37, %v82_v53 }
  0x3e   :  { %v88_v57 = vadd.f32 1e-08, %v75_v55  ;;  %v87_v58 = vsel %vm85_vm4, %v86_v52, %v84_v56 }
  0x3f   :  { %v89_v59 = vadd.f32 1e-08, %v87_v58 }
  0x40   :  { %149 = vrcp.f32 %v88_v57  ;;  %vm95_vm5 = vweird.f32 %v88_v57  ;;  %v101_v63 = vand.u32 2147483648, %v88_v57  ;;  %v99_v2 = vand.u32 2147483647, %v88_v57 }
  0x41   :  { %151 = vrcp.f32 %v89_v59  ;;  %v115_v3 = vand.u32 2147483648, %v89_v59  ;;  %vm109_vm7 = vweird.f32 %v89_v59  ;;  %v113_v5 = vand.u32 2147483647, %v89_v59 }
  0x42   :  { %v102_v7 = vor.u32 1.1754944e-38, %v101_v63  ;;  %vm100_vm10 = vcmp.eq.f32.partialorder %v99_v2, 8.507059e+37 }
  0x43   :  { %v116_v10 = vor.u32 1.1754944e-38, %v115_v3  ;;  %vm114_vm12 = vcmp.eq.f32.partialorder %v113_v5, 8.507059e+37 }
  0x46   :  { %v150_v60 = vpop.eup %149 }
  0x47   :  { %v152_v61 = vpop.eup %151  ;;  %v91_v62 = vmul.f32 %v150_v60, %v88_v57  ;;  %vm96_vm6 = vweird.f32 %v150_v60 }
  0x48   :  { %v105_v0 = vmul.f32 %v152_v61, %v89_v59  ;;  %vm110_vm8 = vweird.f32 %v152_v61  ;;  %vm97_vm9 = vmor %vm95_vm5, %vm96_vm6 }
  0x49   :  { %v92_v1 = vsub.f32 1.0, %v91_v62  ;;  %vm111_vm11 = vmor %vm109_vm7, %vm110_vm8 }
  0x4a   :  { %v106_v4 = vsub.f32 1.0, %v105_v0 }
  0x4b   :  { %v93_v6 = vmul.f32 %v150_v60, %v92_v1 }
  0x4c   :  { %v107_v8 = vmul.f32 %v152_v61, %v106_v4 }
  0x4d   :  { %v94_v9 = vadd.f32 %v150_v60, %v93_v6 }
  0x4e   :  { %v108_v11 = vadd.f32 %v152_v61, %v107_v8 }
  0x4f   :  { %v98_v12 = vsel %vm97_vm9, %v150_v60, %v94_v9 }
  0x50   :  { %v103_v13 = vsel %vm100_vm10, %v102_v7, %v98_v12  ;;  %v112_v14 = vsel %vm111_vm11, %v152_v61, %v108_v11 }
  0x51   :  { %v118_v15 = vmul.f32 %v103_v13, %v227_v18  ;;  %v117_v16 = vsel %vm114_vm12, %v116_v10, %v112_v14 }
  0x52   :  { %v119_v17 = vmul.f32 %v117_v16, %v229_v19 }
  0x53   :  { %120 = vst.msk [vmem:[#allocation5] sm:$0xff] %vm27_vm0, %v118_v15 }
  0x54   :  { %121 = vst.msk [vmem:[#allocation5 + $0x8] sm:$0xff] %vm27_vm0, %v119_v17 }
  0x55   :  { %134 = dma.vmem_to_hbm [thread:$0]  %s127_s13, 256, %s129_s16, [#allocation4], %s206_s11, %s206_s11, %s207_s12  }
  0x56   :  { %203 = dma.done.wait [#allocation4], 256  }
  0x57   :  { %204 = vsyncadd [#allocation4], 4294967040 }
  0x58   :  { %139 = vsyncpa [#allocation3], 1 }
  0x59   :  { %140 = vsyncpa [#allocation4], 1 }

</bundles_post_ra>
